<compile_context>
chip_gen: v6e
topology: v6e:2x2x1
jax: 0.10.0
libtpu: 0.0.40
codegen_flags: <defaults>
</compile_context>

<pallas_src>
import itertools

import jax
import jax.numpy as jnp
from jax.experimental import pallas as pl
from jax.experimental.pallas import tpu as pltpu

# ---- Model configuration (mirrors SINDyModule.__init__ arguments) ----------
FEATURE_NAMES = ["z1", "z2", "z3", "z4"]
PARAM_NAMES = ["p1", "p2"]
MAX_DEGREE = 2
INCLUDE_BIAS = False          # SINDyModule default -> no bias column, no Linear bias
NUM_FEATURES = len(FEATURE_NAMES)
NUM_PARAMS = len(PARAM_NAMES)
OUTPUT_FEATURES = 4
DT = 0.01                     # stored by the module but unused in forward()

Z_DIM = NUM_FEATURES + NUM_PARAMS            # 6 logical rows of z = [x0..x3, p0, p1]
Z_PAD = 8                                    # sublane-padded physical row count
G_ROWS = OUTPUT_FEATURES * (1 + Z_DIM)       # 28 logical rows of G = [W_lin; Q_0..Q_5]
G_PAD = 32                                   # padded to a sublane multiple

# Lanes per grid step.  v5e/v6e could go to 128K, but 64K already amortises the
# ~0.35us/step overhead to <20% and stays comfortably inside v7x's 64 MiB VMEM/TC.
MAX_TB = 65536


def _poly_combos():
    """Monomial index tuples, in the exact order of PolynomialFeatures.forward."""
    combos = []
    for degree in range(1, MAX_DEGREE + 1):
        for terms in itertools.combinations_with_replacement(range(NUM_FEATURES), degree):
            combos.append(terms)
    return combos


def _feature_dim():
    d = 1 if INCLUDE_BIAS else 0
    d += len(_poly_combos())                          # 4 deg-1 + 10 deg-2 = 14
    if PARAM_NAMES is not None:
        d += NUM_PARAMS + NUM_PARAMS * NUM_FEATURES   # 2 params + 8 interactions
    return d


FEATURE_DIM = _feature_dim()  # 14 + 2 + 8 = 24


def _round_up(n, m):
    return (n + m - 1) // m * m


# ---- Weight folding (host/XLA side, runs once on a tiny (4, 24) matrix) -----
def build_g(weight):
    """Fold the nn.Linear weight (O, 24) into G (32, 8) = [W_lin; Q_0 .. Q_5; 0].

    out[o, b] = sum_d W[o, d] * lib_d(x_b, p_b)
              = (W_lin @ z)[o, b] + sum_k z[k, b] * (Q_k @ z)[o, b]
    with z = [x0..x3, p0, p1] and every quadratic library column assigned to exactly
    one (k, m) pair.
    """
    assert not INCLUDE_BIAS, "kernel assumes include_bias=False (module default)"
    w = weight.astype(jnp.float32)
    assert w.shape == (OUTPUT_FEATURES, FEATURE_DIM)

    w_lin = jnp.zeros((OUTPUT_FEATURES, Z_PAD), jnp.float32)
    quads = [jnp.zeros((OUTPUT_FEATURES, Z_PAD), jnp.float32) for _ in range(Z_DIM)]

    col = 0
    # Polynomial terms of x (PolynomialFeatures.forward order).
    for combo in _poly_combos():
        if len(combo) == 1:
            w_lin = w_lin.at[:, combo[0]].set(w[:, col])
        elif len(combo) == 2:
            i, j = combo                       # i <= j; x_i * x_j assigned to Q_i column j
            quads[i] = quads[i].at[:, j].set(w[:, col])
        else:
            raise NotImplementedError("this kernel supports max_degree <= 2 only")
        col += 1
    # Raw parameter columns, then p_j * x_i interactions (forward order).
    if PARAM_NAMES is not None:
        for j in range(NUM_PARAMS):
            w_lin = w_lin.at[:, NUM_FEATURES + j].set(w[:, col])
            col += 1
        for j in range(NUM_PARAMS):
            for i in range(NUM_FEATURES):
                quads[NUM_FEATURES + j] = quads[NUM_FEATURES + j].at[:, i].set(w[:, col])
                col += 1
    assert col == FEATURE_DIM

    g = jnp.concatenate(
        [w_lin] + quads + [jnp.zeros((G_PAD - G_ROWS, Z_PAD), jnp.float32)], axis=0
    )
    return g                                   # (32, 8)


# ---- Pallas kernel ----------------------------------------------------------
def sindy_kernel(z_ref, g_ref, o_ref):
    """z_ref: (Z_PAD, TB), g_ref: (G_PAD, Z_PAD), o_ref: (O, TB).

    out = Y[0:4] + sum_k z_k * Y[4+4k : 8+4k]   with   Y = G @ z.
    """
    z = z_ref[...]                                                     # (8, TB) f32
    y = jnp.dot(g_ref[...], z, preferred_element_type=jnp.float32)    # (32, TB) f32, MXU

    acc = y[0:OUTPUT_FEATURES, :]                                      # linear part
    for k in range(Z_DIM):                                             # quadratic parts
        r0 = OUTPUT_FEATURES * (1 + k)
        acc = acc + z[k:k + 1, :] * y[r0:r0 + OUTPUT_FEATURES, :]
    o_ref[...] = acc


# ---- Wrappers ----------------------------------------------------------------
def _pick_tb(b_pad):
    # Large lane tiles amortise the per-step overhead; try for >= 2 grid steps so
    # dimension_semantics=("parallel",) can feed both v7x TensorCores.
    if b_pad <= 128:
        return b_pad
    return min(MAX_TB, _round_up(pl.cdiv(b_pad, 2), 128))


def sindy_forward_feature_major(z_fm, g):
    """Relayout-free entry point.

    z_fm: (Z_PAD, B_pad) float32, rows = [x0..x3, p0, p1, 0, 0], B_pad a multiple of 128.
    g   : (G_PAD, Z_PAD) float32 from build_g(weight).
    Returns (OUTPUT_FEATURES, B_pad) float32.
    """
    assert z_fm.shape[0] == Z_PAD and z_fm.shape[1] % 128 == 0
    assert g.shape == (G_PAD, Z_PAD)
    b_pad = z_fm.shape[1]
    tb = _pick_tb(b_pad)
    grid = (pl.cdiv(b_pad, tb),)               # ragged last tile handled by Pallas masking

    return pl.pallas_call(
        sindy_kernel,
        out_shape=jax.ShapeDtypeStruct((OUTPUT_FEATURES, b_pad), jnp.float32),
        grid=grid,
        in_specs=[
            pl.BlockSpec((Z_PAD, tb), lambda i: (0, i)),
            pl.BlockSpec((G_PAD, Z_PAD), lambda i: (0, 0)),   # grid-invariant weights
        ],
        out_specs=pl.BlockSpec((OUTPUT_FEATURES, tb), lambda i: (0, i)),
        compiler_params=pltpu.CompilerParams(
            dimension_semantics=("parallel",),
            vmem_limit_bytes=48 * 1024 * 1024,
        ),
    )(z_fm, g)


@jax.jit
def sindy_forward(x, params, weight):
    """Torch-layout interface: x (B, F), params (B, P), weight (O, FEATURE_DIM).

    Returns (B, O) float32, identical to SINDyModule.forward(x, params).
    """
    batch = x.shape[0]
    b_pad = _round_up(batch, 128)              # pad to a lane multiple only, never to a tile

    # Single fused pad+transpose pass to feature-major layout.  Producers that can emit
    # (features, batch) data directly should call sindy_forward_feature_major instead.
    # TODO(synk): fuse this relayout into the upstream producer of x/params to remove the
    # remaining extra HBM pass.
    z_fm = jnp.zeros((Z_PAD, b_pad), jnp.float32)
    z_fm = z_fm.at[:NUM_FEATURES, :batch].set(x.T.astype(jnp.float32))
    z_fm = z_fm.at[NUM_FEATURES:Z_DIM, :batch].set(params.T.astype(jnp.float32))

    g = build_g(weight)
    out_fm = sindy_forward_feature_major(z_fm, g)      # (O, b_pad)
    return out_fm[:, :batch].T                         # back to (B, O)


# ---- Pure-JAX reference (verification only) ----------------------------------
def _reference(x, params, weight):
    batch = x.shape[0]
    cols = []
    if INCLUDE_BIAS:
        cols.append(jnp.ones((batch, 1), jnp.float32))
    for combo in _poly_combos():
        t = jnp.ones((batch,), jnp.float32)
        for idx in combo:
            t = t * x[:, idx]
        cols.append(t[:, None])
    if PARAM_NAMES is not None:
        for j in range(NUM_PARAMS):
            cols.append(params[:, j][:, None])
        for j in range(NUM_PARAMS):
            for i in range(NUM_FEATURES):
                cols.append((params[:, j] * x[:, i])[:, None])
    lib = jnp.concatenate(cols, axis=1)                 # (B, 24)
    return lib @ weight.T                               # (B, O), no bias


if __name__ == "__main__":
    key = jax.random.PRNGKey(0)
    kx, kp, kw = jax.random.split(key, 3)

    B = 2
    # Inputs/weights are quantized to coarse dyadic values so the check is robust to
    # any bf16 MXU passes (both kernel and reference are then exact in float32).
    x = jnp.round(jax.random.normal(kx, (B, NUM_FEATURES), dtype=jnp.float32) * 4.0) / 4.0
    params = jnp.round(jax.random.normal(kp, (B, NUM_PARAMS), dtype=jnp.float32) * 4.0) / 4.0
    # torch.nn.init.uniform_(self.coefficients.weight, a=0.0, b=2.0)
    weight = jax.random.uniform(
        kw, (OUTPUT_FEATURES, FEATURE_DIM), dtype=jnp.float32, minval=0.0, maxval=2.0
    )
    weight = jnp.round(weight * 8.0) / 8.0

    out = jax.block_until_ready(sindy_forward(x, params, weight))
    ref = _reference(x, params, weight)

    assert out.shape == (B, OUTPUT_FEATURES)
    assert jnp.allclose(out, ref, atol=1e-5, rtol=1e-5), (out, ref)

    print("KERNEL_OK")
</pallas_src>

<mosaic_0001>
module attributes {stable_mosaic.version = 11 : i64} {
  func.func @sindy_kernel(%arg0: i32, %arg1: memref<8x128xf32, #tpu.memory_space<vmem>>, %arg2: memref<32x8xf32, #tpu.memory_space<vmem>>, %arg3: memref<4x128xf32, #tpu.memory_space<vmem>>) attributes {dimension_semantics = [#tpu.dimension_semantics<parallel>], iteration_bounds = array<i64: 1>, scalar_prefetch = 0 : i64, scratch_operands = 0 : i64, tpu.core_type = #tpu.core_type<tc>, window_params = [{transform_indices = @transform_0, window_bounds = array<i64: 8, 128>}, {pipeline_mode = #tpu.pipeline_mode<synchronous>, transform_indices = @transform_1, window_bounds = array<i64: 32, 8>}, {transform_indices = @transform_2, window_bounds = array<i64: 4, 128>}]} {
    %c0 = arith.constant 0 : index
    %c0_0 = arith.constant 0 : index
    %0 = vector.load %arg1[%c0, %c0_0] : memref<8x128xf32, #tpu.memory_space<vmem>>, vector<8x128xf32>
    %c0_1 = arith.constant 0 : index
    %c0_2 = arith.constant 0 : index
    %1 = vector.load %arg2[%c0_1, %c0_2] : memref<32x8xf32, #tpu.memory_space<vmem>>, vector<32x8xf32>
    %cst = arith.constant dense<0.000000e+00> : vector<32x128xf32>
    %2 = tpu.matmul %1, %0, %cst {dimension_numbers = #tpu.dot_dimension_numbers<[1], [0], [0], [1], [0, 0, 1, 1], [], []>} : vector<32x8xf32>, vector<8x128xf32>, vector<32x128xf32> -> vector<32x128xf32>
    %3 = vector.extract_strided_slice %2 {offsets = [0, 0], sizes = [4, 128], strides = [1, 1]} : vector<32x128xf32> to vector<4x128xf32>
    %4 = vector.extract_strided_slice %0 {offsets = [0, 0], sizes = [1, 128], strides = [1, 1]} : vector<8x128xf32> to vector<1x128xf32>
    %5 = vector.extract_strided_slice %2 {offsets = [4, 0], sizes = [4, 128], strides = [1, 1]} : vector<32x128xf32> to vector<4x128xf32>
    %6 = vector.broadcast %4 : vector<1x128xf32> to vector<4x128xf32>
    %7 = arith.mulf %6, %5 : vector<4x128xf32>
    %8 = arith.addf %3, %7 : vector<4x128xf32>
    %9 = vector.extract_strided_slice %0 {offsets = [1, 0], sizes = [1, 128], strides = [1, 1]} : vector<8x128xf32> to vector<1x128xf32>
    %10 = vector.extract_strided_slice %2 {offsets = [8, 0], sizes = [4, 128], strides = [1, 1]} : vector<32x128xf32> to vector<4x128xf32>
    %11 = vector.broadcast %9 : vector<1x128xf32> to vector<4x128xf32>
    %12 = arith.mulf %11, %10 : vector<4x128xf32>
    %13 = arith.addf %8, %12 : vector<4x128xf32>
    %14 = vector.extract_strided_slice %0 {offsets = [2, 0], sizes = [1, 128], strides = [1, 1]} : vector<8x128xf32> to vector<1x128xf32>
    %15 = vector.extract_strided_slice %2 {offsets = [12, 0], sizes = [4, 128], strides = [1, 1]} : vector<32x128xf32> to vector<4x128xf32>
    %16 = vector.broadcast %14 : vector<1x128xf32> to vector<4x128xf32>
    %17 = arith.mulf %16, %15 : vector<4x128xf32>
    %18 = arith.addf %13, %17 : vector<4x128xf32>
    %19 = vector.extract_strided_slice %0 {offsets = [3, 0], sizes = [1, 128], strides = [1, 1]} : vector<8x128xf32> to vector<1x128xf32>
    %20 = vector.extract_strided_slice %2 {offsets = [16, 0], sizes = [4, 128], strides = [1, 1]} : vector<32x128xf32> to vector<4x128xf32>
    %21 = vector.broadcast %19 : vector<1x128xf32> to vector<4x128xf32>
    %22 = arith.mulf %21, %20 : vector<4x128xf32>
    %23 = arith.addf %18, %22 : vector<4x128xf32>
    %24 = vector.extract_strided_slice %0 {offsets = [4, 0], sizes = [1, 128], strides = [1, 1]} : vector<8x128xf32> to vector<1x128xf32>
    %25 = vector.extract_strided_slice %2 {offsets = [20, 0], sizes = [4, 128], strides = [1, 1]} : vector<32x128xf32> to vector<4x128xf32>
    %26 = vector.broadcast %24 : vector<1x128xf32> to vector<4x128xf32>
    %27 = arith.mulf %26, %25 : vector<4x128xf32>
    %28 = arith.addf %23, %27 : vector<4x128xf32>
    %29 = vector.extract_strided_slice %0 {offsets = [5, 0], sizes = [1, 128], strides = [1, 1]} : vector<8x128xf32> to vector<1x128xf32>
    %30 = vector.extract_strided_slice %2 {offsets = [24, 0], sizes = [4, 128], strides = [1, 1]} : vector<32x128xf32> to vector<4x128xf32>
    %31 = vector.broadcast %29 : vector<1x128xf32> to vector<4x128xf32>
    %32 = arith.mulf %31, %30 : vector<4x128xf32>
    %33 = arith.addf %28, %32 : vector<4x128xf32>
    %c0_3 = arith.constant 0 : index
    %c0_4 = arith.constant 0 : index
    %34 = vector.load %arg3[%c0_3, %c0_4] : memref<4x128xf32, #tpu.memory_space<vmem>>, vector<4x128xf32>
    tpu.vector_store %arg3[%c0_3, %c0_4], %33 {strides = array<i32>} : memref<4x128xf32, #tpu.memory_space<vmem>>, vector<4x128xf32>,
    return
  }
  func.func @transform_0(%arg0: i32) -> (i32, i32) {
    %c0_i32 = arith.constant 0 : i32
    %c0_i32_0 = arith.constant 0 : i32
    return %c0_i32, %arg0 : i32, i32
  }
  func.func @transform_1(%arg0: i32) -> (i32, i32) {
    %c0_i32 = arith.constant 0 : i32
    %c0_i32_0 = arith.constant 0 : i32
    %c0_i32_1 = arith.constant 0 : i32
    return %c0_i32, %c0_i32_0 : i32, i32
  }
  func.func @transform_2(%arg0: i32) -> (i32, i32) {
    %c0_i32 = arith.constant 0 : i32
    %c0_i32_0 = arith.constant 0 : i32
    return %c0_i32, %arg0 : i32, i32
  }
}

</mosaic_0001>

<bundles_post_ra>
// kernel: sindy_forward.1
= control target key start
LH: loop header
LB: loop body
LE: loop exit
PB: predicated region body
PF: predicated region fallthrough
CT: control target
= control target key end

     0   :  { %vm16_vm0 = vcmask 64512   ;;  %v114_v5 = vlaneseq  ;;  %s216_s0 = inlined_call_operand.vmem [shape: f32[8,128], index: 0, kind: input, shape index: {}]   ;;  %s217_s1 = inlined_call_operand.vmem [shape: f32[32,8], index: 1, kind: input, shape index: {}]   ;;  %s218_s2 = inlined_call_operand.vmem [shape: f32[4,128], index: 2, kind: output, shape index: {}]  }
   0x1   :  { %v11_v0 = vld [vmem:[%s216_s0] sm:$0xff]  ;;  %v13_v2 = vld [vmem:[%s217_s1 + $0x8] sm:$0xff]  ;;  %v14_v3 = vld [vmem:[%s217_s1 + $0x10] sm:$0xff] }
   0x2   :  { %v12_v1 = vld [vmem:[%s217_s1] sm:$0xff]  ;;  %173 = vmatprep.subr.mxu0 %v11_v0  ;;  %181 = vmatprep.subr.mxu1 %v11_v0  ;;  %v15_v4 = vld [vmem:[%s217_s1 + $0x18] sm:$0xff]  ;;  %v115_v6 = vshrl.u32 %v114_v5, 7 }
   0x3   :  { %175 = vmatprep.mubr.msk.f32.mxu0 %vm16_vm0, %v12_v1  ;;  %174 = vmatpush3.msra.mxu0 %v11_v0 }
   0x4   :  { %176 = vmatmul.mubr.msk.f32.vlgmr.msra.gmra.mxu0 %vm16_vm0, %v13_v2  ;;  %182 = vmatpush3.msra.mxu1 %v11_v0  ;;  %v116_v7 = vsub.s32 0, %v115_v6  ;;  %v131_v8 = vsub.s32 2, %v115_v6  ;;  %v125_v9 = vsub.s32 1, %v115_v6  ;;  %v146_v13 = vsub.s32 4, %v115_v6 }
   0x5   :  { %178 = vmatprep.mubr.msk.f32.mxu1 %vm16_vm0, %v14_v3  ;;  %v140_v18 = vsub.s32 3, %v115_v6  ;;  %v155_v25 = vsub.s32 5, %v115_v6 }
   0x6   :  { %179 = vmatmul.mubr.msk.f32.vlgmr.msra.gmra.mxu1 %vm16_vm0, %v15_v4  ;;  %v117_v10 = vrot.slane %v11_v0, %v116_v7  ;;  %v132_v12 = vrot.slane %v11_v0, %v131_v8  ;;  %v126_v16 = vrot.slane %v11_v0, %v125_v9  ;;  %v147_v21 = vrot.slane %v11_v0, %v146_v13 }
   0x7   :  { %v141_v26 = vrot.slane %v11_v0, %v140_v18  ;;  %v156_v30 = vrot.slane %v11_v0, %v155_v25 }
  0xc4   :  { %v177_v11 = vpop.f32.mrf.mxu0 }
  0xc5   :  { %v133_v19 = vmul.f32 %v177_v11, %v132_v12  ;;  %v127_v23 = vmul.f32 %v177_v11, %v126_v16 }
  0xc6   :  { %v95_v14 = vpop.f32.mrf.mxu0  ;;  %v180_v15 = vpop.f32.mrf.mxu1 }
  0xc7   :  { %v118_v17 = vmul.f32 %v117_v10, %v95_v14  ;;  %v135_v27 = vrot.slane %v133_v19, 4  ;;  %v157_v35 = vmul.f32 %v180_v15, %v156_v30 }
  0xc8   :  { %v105_v22 = vpop.f32.mrf.mxu1 }
  0xc9   :  { %v120_v20 = vrot.slane %v118_v17, 4  ;;  %v148_v29 = vmul.f32 %v147_v21, %v105_v22  ;;  %v142_v32 = vmul.f32 %v141_v26, %v105_v22 }
  0xcb   :  { %v122_v24 = vadd.f32 %v120_v20, %v95_v14  ;;  %v150_v34 = vrot.slane %v148_v29, 4 }
  0xcd   :  { %v128_v28 = vadd.f32 %v127_v23, %v122_v24 }
  0xcf   :  { %v137_v31 = vadd.f32 %v135_v27, %v128_v28 }
  0xd1   :  { %v143_v33 = vadd.f32 %v142_v32, %v137_v31 }
  0xd3   :  { %v152_v36 = vadd.f32 %v150_v34, %v143_v33 }
  0xd5   :  { %v158_v37 = vadd.f32 %v157_v35, %v152_v36 }
  0xd7   :  { %159 = vst [vmem:[%s218_s2] sm:$0xf] %v158_v37 }

</bundles_post_ra>
